<compile_context>
chip_gen: v5e
topology: v5e:2x2
jax: 0.10.0
libtpu: 0.0.40
codegen_flags: <defaults>
</compile_context>

<pallas_src>
import functools

import jax
import jax.numpy as jnp
from jax import lax
from jax.experimental import pallas as pl
from jax.experimental.pallas import tpu as pltpu


def _round_up(x, m):
    return (x + m - 1) // m * m


# -----------------------------------------------------------------------------
# Pallas kernel: tiled matmul (x @ w.T) + bias, f32 accumulation
# -----------------------------------------------------------------------------
def _mlinear_kernel(x_ref, w_ref, b_ref, o_ref, acc_ref):
    # x_ref : (tm, tk)   w_ref : (tn, tk)   b_ref : (1, tn)
    # o_ref : (tm, tn)   acc_ref : (tm, tn) f32 scratch (persists across k)
    k = pl.program_id(2)

    @pl.when(k == 0)
    def _():
        acc_ref[...] = jnp.zeros_like(acc_ref)

    # Contract the K axis of both tiles: x (tm,tk) . w (tn,tk)^T -> (tm,tn).
    acc_ref[...] += lax.dot_general(
        x_ref[...],
        w_ref[...],
        dimension_numbers=(((1,), (1,)), ((), ())),
        preferred_element_type=jnp.float32,
    )

    @pl.when(k == pl.num_programs(2) - 1)
    def _():
        o_ref[...] = (acc_ref[...] + b_ref[...].astype(jnp.float32)).astype(o_ref.dtype)


def mlinear_matmul_bias(x2d, w_nk, bias, *, tm=256, tn=256, tk=512,
                        compute_dtype=jnp.bfloat16):
    """x2d: (M, K), w_nk: (N, K) (UNtransposed weight), bias: (N,) -> (M, N)."""
    M, K = x2d.shape
    N, K2 = w_nk.shape
    assert K == K2 and bias.shape == (N,)
    out_dtype = x2d.dtype

    # Clamp tile sizes to the (padded) problem, keeping (8,128)/MXU alignment.
    # v6e (128 MiB VMEM) tolerates larger tiles; v7x (64 MiB) / v5e (16 MiB
    # scoped default) are comfortable with these defaults (~2 MiB total here).
    tm = min(tm, _round_up(M, 8))
    tn = min(tn, _round_up(N, 128))
    tk = min(tk, _round_up(K, 128))

    M_pad = _round_up(M, tm)
    N_pad = _round_up(N, tn)
    K_pad = _round_up(K, tk)

    # Zero-pad (zeros contribute nothing to the contraction) and cast to bf16
    # for the MXU; accumulation stays f32 inside the kernel.
    x_p = jnp.zeros((M_pad, K_pad), compute_dtype).at[:M, :K].set(
        x2d.astype(compute_dtype))
    w_p = jnp.zeros((N_pad, K_pad), compute_dtype).at[:N, :K].set(
        w_nk.astype(compute_dtype))
    b_p = jnp.zeros((1, N_pad), jnp.float32).at[0, :N].set(
        bias.astype(jnp.float32))

    grid = (M_pad // tm, N_pad // tn, K_pad // tk)

    cost = pl.CostEstimate(
        flops=2 * M_pad * N_pad * K_pad,
        transcendentals=0,
        bytes_accessed=(x_p.size * x_p.dtype.itemsize
                        + w_p.size * w_p.dtype.itemsize
                        + b_p.size * b_p.dtype.itemsize
                        + M_pad * N_pad * jnp.dtype(out_dtype).itemsize),
    )

    out_p = pl.pallas_call(
        _mlinear_kernel,
        out_shape=jax.ShapeDtypeStruct((M_pad, N_pad), out_dtype),
        grid_spec=pltpu.PrefetchScalarGridSpec(
            num_scalar_prefetch=0,
            grid=grid,
            in_specs=[
                pl.BlockSpec((tm, tk), lambda i, j, k: (i, k)),   # x tile
                pl.BlockSpec((tn, tk), lambda i, j, k: (j, k)),   # weight tile (N,K)
                pl.BlockSpec((1, tn), lambda i, j, k: (0, j)),    # bias row
            ],
            out_specs=pl.BlockSpec((tm, tn), lambda i, j, k: (i, j)),
            scratch_shapes=[pltpu.VMEM((tm, tn), jnp.float32)],
        ),
        compiler_params=pltpu.CompilerParams(
            dimension_semantics=("parallel", "parallel", "arbitrary"),
        ),
        cost_estimate=cost,
    )(x_p, w_p, b_p)

    return out_p[:M, :N]


# -----------------------------------------------------------------------------
# Parameter / glue logic (plain JAX): top-k scatter to build the effective weight
# -----------------------------------------------------------------------------
def build_effective_weight(weight, mask, top_k):
    """Mirror torch: weight.data.zero_(); weight.data.scatter_(1, topk_idx, mask)."""
    if top_k <= 0:
        return weight
    out_features = weight.shape[0]
    _, indices = jax.lax.top_k(mask, top_k)              # (out, top_k), unique per row
    row_idx = jnp.arange(out_features)[:, None]          # (out, 1)
    # scatter_(1, indices, mask): weight[i, indices[i, j]] = mask[i, j], j < top_k
    w = jnp.zeros_like(weight)
    w = w.at[row_idx, indices].set(mask[:, :top_k])
    return w


@functools.partial(jax.jit, static_argnames=("top_k",))
def mlinear_forward(x, weight, bias, mask, top_k):
    # NOTE: if the effective weight is reused across many forward calls, build
    # it once outside the hot loop (it is a pure function of weight/mask/top_k)
    # to avoid re-doing the top_k + scatter and its HBM round-trip each step.
    eff_w = build_effective_weight(weight, mask, top_k)   # (out, in), NOT transposed
    lead_shape = x.shape[:-1]
    K = x.shape[-1]
    N = eff_w.shape[0]
    x2d = x.reshape(-1, K)
    out2d = mlinear_matmul_bias(x2d, eff_w, bias)
    return out2d.reshape(*lead_shape, N)


# -----------------------------------------------------------------------------
# Demo / self-test
# -----------------------------------------------------------------------------
if __name__ == "__main__":
    in_features = 32
    out_features = 16
    top_k = 4
    batch, seq = 2, 8

    key = jax.random.PRNGKey(0)
    k_w, k_b, k_m, k_x = jax.random.split(key, 4)

    # torch.randn-style deterministic parameter init (synthetic, no checkpoint)
    weight = jax.random.normal(k_w, (out_features, in_features), jnp.float32)
    bias = jax.random.normal(k_b, (out_features,), jnp.float32)
    mask = jax.random.normal(k_m, (out_features, in_features), jnp.float32)
    x = jax.random.normal(k_x, (batch, seq, in_features), jnp.float32)

    out = mlinear_forward(x, weight, bias, mask, top_k)
    out = jax.block_until_ready(out)
    assert out.shape == (batch, seq, out_features)

    # Reference 1: matched precision (bf16 inputs, f32 accumulate) — tight check.
    eff_w = build_effective_weight(weight, mask, top_k)
    x2d = x.reshape(-1, in_features)
    ref2d = lax.dot_general(
        x2d.astype(jnp.bfloat16), eff_w.astype(jnp.bfloat16),
        dimension_numbers=(((1,), (1,)), ((), ())),
        preferred_element_type=jnp.float32,
    ) + bias.astype(jnp.float32)
    ref_bf16 = ref2d.reshape(batch, seq, out_features).astype(x.dtype)
    assert jnp.allclose(out, ref_bf16, atol=1e-2, rtol=1e-2)

    # Reference 2: full f32 math — loose sanity check on the bf16 MXU path.
    ref_f32 = x @ eff_w.T + bias
    assert jnp.allclose(out, ref_f32, atol=1e-1, rtol=1e-1)

    print("KERNEL_OK")
</pallas_src>

<mosaic_0001>
module attributes {stable_mosaic.version = 11 : i64} {
  func.func @_mlinear_kernel(%arg0: i32, %arg1: i32, %arg2: i32, %arg3: memref<16x128xbf16, #tpu.memory_space<vmem>>, %arg4: memref<128x128xbf16, #tpu.memory_space<vmem>>, %arg5: memref<1x128xf32, #tpu.memory_space<vmem>>, %arg6: memref<16x128xf32, #tpu.memory_space<vmem>>, %arg7: memref<16x128xf32, #tpu.memory_space<vmem>>) attributes {dimension_semantics = [#tpu.dimension_semantics<parallel>, #tpu.dimension_semantics<parallel>, #tpu.dimension_semantics<arbitrary>], iteration_bounds = array<i64: 1, 1, 1>, scalar_prefetch = 0 : i64, scratch_operands = 1 : i64, tpu.core_type = #tpu.core_type<tc>, window_params = [{transform_indices = @transform_0, window_bounds = array<i64: 16, 128>}, {transform_indices = @transform_1, window_bounds = array<i64: 128, 128>}, {transform_indices = @transform_2, window_bounds = array<i64: 1, 128>}, {transform_indices = @transform_3, window_bounds = array<i64: 16, 128>}]} {
    %c0_i32 = arith.constant 0 : i32
    %0 = arith.cmpi eq, %arg2, %c0_i32 : i32
    %1 = arith.extui %0 : i1 to i32
    %c0_i32_0 = arith.constant 0 : i32
    %2 = arith.cmpi ne, %1, %c0_i32_0 : i32
    scf.if %2 {
      %cst_10 = arith.constant 0.000000e+00 : f32
      %12 = vector.broadcast %cst_10 : f32 to vector<16x128xf32>
      %c0_11 = arith.constant 0 : index
      %c0_12 = arith.constant 0 : index
      %13 = vector.load %arg7[%c0_11, %c0_12] : memref<16x128xf32, #tpu.memory_space<vmem>>, vector<16x128xf32>
      tpu.vector_store %arg7[%c0_11, %c0_12], %12 {strides = array<i32>} : memref<16x128xf32, #tpu.memory_space<vmem>>, vector<16x128xf32>,
    } else {
    }
    %c0 = arith.constant 0 : index
    %c0_1 = arith.constant 0 : index
    %3 = vector.load %arg7[%c0, %c0_1] : memref<16x128xf32, #tpu.memory_space<vmem>>, vector<16x128xf32>
    %c0_2 = arith.constant 0 : index
    %c0_3 = arith.constant 0 : index
    %4 = vector.load %arg3[%c0_2, %c0_3] : memref<16x128xbf16, #tpu.memory_space<vmem>>, vector<16x128xbf16>
    %c0_4 = arith.constant 0 : index
    %c0_5 = arith.constant 0 : index
    %5 = vector.load %arg4[%c0_4, %c0_5] : memref<128x128xbf16, #tpu.memory_space<vmem>>, vector<128x128xbf16>
    %cst = arith.constant dense<0.000000e+00> : vector<16x128xf32>
    %6 = tpu.matmul %4, %5, %cst {dimension_numbers = #tpu.dot_dimension_numbers<[1], [1], [0], [0], [0, 0, 1, 0], [], []>} : vector<16x128xbf16>, vector<128x128xbf16>, vector<16x128xf32> -> vector<16x128xf32>
    %7 = arith.addf %3, %6 : vector<16x128xf32>
    %c0_6 = arith.constant 0 : index
    %c0_7 = arith.constant 0 : index
    %8 = vector.load %arg7[%c0_6, %c0_7] : memref<16x128xf32, #tpu.memory_space<vmem>>, vector<16x128xf32>
    tpu.vector_store %arg7[%c0_6, %c0_7], %7 {strides = array<i32>} : memref<16x128xf32, #tpu.memory_space<vmem>>, vector<16x128xf32>,
    %c0_i32_8 = arith.constant 0 : i32
    %9 = arith.cmpi eq, %arg2, %c0_i32_8 : i32
    %10 = arith.extui %9 : i1 to i32
    %c0_i32_9 = arith.constant 0 : i32
    %11 = arith.cmpi ne, %10, %c0_i32_9 : i32
    scf.if %11 {
      %c0_10 = arith.constant 0 : index
      %c0_11 = arith.constant 0 : index
      %12 = vector.load %arg7[%c0_10, %c0_11] : memref<16x128xf32, #tpu.memory_space<vmem>>, vector<16x128xf32>
      %c0_12 = arith.constant 0 : index
      %c0_13 = arith.constant 0 : index
      %13 = vector.load %arg5[%c0_12, %c0_13] : memref<1x128xf32, #tpu.memory_space<vmem>>, vector<1x128xf32>
      %14 = vector.broadcast %13 : vector<1x128xf32> to vector<16x128xf32>
      %15 = arith.addf %12, %14 : vector<16x128xf32>
      %c0_14 = arith.constant 0 : index
      %c0_15 = arith.constant 0 : index
      %16 = vector.load %arg6[%c0_14, %c0_15] : memref<16x128xf32, #tpu.memory_space<vmem>>, vector<16x128xf32>
      tpu.vector_store %arg6[%c0_14, %c0_15], %15 {strides = array<i32>} : memref<16x128xf32, #tpu.memory_space<vmem>>, vector<16x128xf32>,
    } else {
    }
    return
  }
  func.func @transform_0(%arg0: i32, %arg1: i32, %arg2: i32) -> (i32, i32) {
    %c0_i32 = arith.constant 0 : i32
    return %arg0, %arg2 : i32, i32
  }
  func.func @transform_1(%arg0: i32, %arg1: i32, %arg2: i32) -> (i32, i32) {
    %c0_i32 = arith.constant 0 : i32
    return %arg1, %arg2 : i32, i32
  }
  func.func @transform_2(%arg0: i32, %arg1: i32, %arg2: i32) -> (i32, i32) {
    %c0_i32 = arith.constant 0 : i32
    %c0_i32_0 = arith.constant 0 : i32
    return %c0_i32, %arg1 : i32, i32
  }
  func.func @transform_3(%arg0: i32, %arg1: i32, %arg2: i32) -> (i32, i32) {
    %c0_i32 = arith.constant 0 : i32
    return %arg0, %arg1 : i32, i32
  }
}

</mosaic_0001>

<bundles_post_ra>
// kernel: mlinear_forward.1
= control target key start
LH: loop header
LB: loop body
LE: loop exit
PB: predicated region body
PF: predicated region fallthrough
CT: control target
= control target key end

     0   :  { %s231_s1 = inlined_call_operand.vmem [shape: bf16[128,128], index: 1, kind: input, shape index: {}]   ;;  %s232_s2 = inlined_call_operand.vmem [shape: f32[1,128], index: 2, kind: input, shape index: {}]   ;;  %s233_s0 = inlined_call_operand.vmem [shape: bf16[16,128], index: 0, kind: input, shape index: {}]   ;;  %s234_s3 = inlined_call_operand.vmem [shape: f32[16,128], index: 3, kind: output, shape index: {}]  }
   0x1   :  { %v173_v0 = vld [vmem:[%s231_s1 + $0x38] sm:$0xff]  ;;  %v172_v1 = vld [vmem:[%s231_s1 + $0x30] sm:$0xff]  ;;  %v171_v2 = vld [vmem:[%s231_s1 + $0x28] sm:$0xff] }
   0x2   :  { %94 = vmatpush.bf16.xpose.msra.mxu0 %v173_v0  ;;  %v170_v3 = vld [vmem:[%s231_s1 + $0x20] sm:$0xff]  ;;  %v169_v4 = vld [vmem:[%s231_s1 + $0x18] sm:$0xff]  ;;  %v168_v5 = vld [vmem:[%s231_s1 + $0x10] sm:$0xff] }
   0x3   :  { %v167_v6 = vld [vmem:[%s231_s1 + $0x8] sm:$0xff]  ;;  %v166_v7 = vld [vmem:[%s231_s1] sm:$0xff] }
   0x4   :  { %v165_v8 = vld [vmem:[%s233_s0] sm:$0xff] }
   0x5   :  { %v174_v9 = vld [vmem:[%s232_s2] ss:$0 sm:$0xff] }
   0xa   :  { %95 = vmatpush.bf16.xpose.msra.mxu0 %v172_v1 }
  0x12   :  { %96 = vmatpush.bf16.xpose.msra.mxu0 %v171_v2 }
  0x1a   :  { %97 = vmatpush.bf16.xpose.msra.mxu0 %v170_v3 }
  0x22   :  { %98 = vmatpush.bf16.xpose.msra.mxu0 %v169_v4 }
  0x2a   :  { %99 = vmatpush.bf16.xpose.msra.mxu0 %v168_v5 }
  0x32   :  { %100 = vmatpush.bf16.xpose.msra.mxu0 %v167_v6 }
  0x3a   :  { %101 = vmatpush.bf16.xpose.msra.mxu0 %v166_v7 }
  0x41   :  { %102 = vmatmul.bf16.vlgmr.msra.gmra.mxu0 %v165_v8 }
  0xbe   :  { %v103_v10 = vpop.f32.mrf.mxu0 }
  0xbf   :  { %v121_v11 = vadd.f32 %v174_v9, %v103_v10 }
  0xc1   :  { %123 = vst [vmem:[%s234_s3] sm:$0xff] %v121_v11 }
  0xc6   :  { %v105_v12 = vpop.f32.mrf.mxu0 }
  0xc7   :  { %v122_v13 = vadd.f32 %v174_v9, %v105_v12 }
  0xc9   :  { %124 = vst [vmem:[%s234_s3 + $0x8] sm:$0xff] %v122_v13 }

</bundles_post_ra>
